<compile_context>
chip_gen: v7x
topology: tpu7x:2x2x1
jax: 0.10.0
libtpu: 0.0.40
codegen_flags: <defaults>
</compile_context>

<pallas_src>
import jax
import jax.numpy as jnp
from jax.experimental import pallas as pl
from jax.experimental.pallas import tpu as pltpu


def _make_kernel(in_f):
    """Kernel over refs: (xT, w_col_0..w_col_{IN-1}, b_col, out)."""

    def kernel(*refs):
        x_ref = refs[0]                   # (IN, TN)   lane-dense x tile
        w_col_refs = refs[1:1 + in_f]     # IN refs of shape (2*OUT, 1)
        b_ref = refs[1 + in_f]            # (2*OUT, 1)
        o_ref = refs[2 + in_f]            # (2*OUT, TN)
        acc = b_ref[...]                  # (2*OUT, 1), lane-broadcasts below
        # Tiny K: VPU broadcast multiply-adds instead of a <0.1%-utilized MXU matmul.
        for k in range(in_f):
            acc = acc + w_col_refs[k][...] * x_ref[k:k + 1, :]   # (2*OUT,1)*(1,TN)
        o_ref[...] = acc.astype(o_ref.dtype)                      # single unmasked store

    return kernel


def _round_down(v, m):
    return (v // m) * m


def model_forward(x, w, b, *, tn_max=32768, min_pallas_n=2048):
    """x: (N, IN) f32, w: (OUT, IN) (torch.nn.Linear layout), b: (OUT,).
    Returns (2*OUT, N), matching the PyTorch module's stack/flatten pipeline."""
    n, in_f = x.shape
    out_f, in_f_w = w.shape
    assert in_f_w == in_f
    out2 = 2 * out_f

    if n < min_pallas_n:
        # Small-N fallback: kernel launch + pipeline prologue dominates here;
        # a fused XLA expression is strictly faster.
        y = x @ w.T + b
        return jnp.concatenate([y, y], axis=1).T

    # Hoist the duplication / layout prep out of the kernel.
    w_dup = jnp.concatenate([w, w], axis=0)              # (2*OUT, IN)
    b_col = jnp.concatenate([b, b]).reshape(out2, 1)     # (2*OUT, 1)
    w_cols = [w_dup[:, k:k + 1] for k in range(in_f)]    # IN columns of (2*OUT, 1)
    xt = x.T                                             # (IN, N): lane-dense tiles

    # Tile size: multiple of 128, as big as VMEM comfortably allows, but capped
    # so the grid always has >= 2 steps (v7x megacore sharding).
    tn_max = max(128, _round_down(tn_max, 128))
    tn = min(tn_max, max(128, _round_down(n // 2, 128)))
    grid = (pl.cdiv(n, tn),)

    return pl.pallas_call(
        _make_kernel(in_f),
        out_shape=jax.ShapeDtypeStruct((out2, n), x.dtype),
        grid=grid,
        in_specs=(
            [pl.BlockSpec((in_f, tn), lambda i: (0, i))]                      # xT tile
            + [pl.BlockSpec((out2, 1), lambda i: (0, 0)) for _ in range(in_f)]  # w cols
            + [pl.BlockSpec((out2, 1), lambda i: (0, 0))]                     # bias col
        ),
        out_specs=pl.BlockSpec((out2, tn), lambda i: (0, i)),                 # lane-dense out
        compiler_params=pltpu.CompilerParams(
            dimension_semantics=("parallel",),       # batch tiles are independent
            vmem_limit_bytes=32 * 1024 * 1024,       # safe on v5e/v6e/v7x
        ),
    )(xt, *w_cols, b_col)


def _reference(x, w, b):
    y = x @ w.T + b
    return jnp.concatenate([y, y], axis=1).T


if __name__ == "__main__":
    key = jax.random.PRNGKey(0)
    kx, kw, kb, kx2, kx3 = jax.random.split(key, 5)

    # Shapes implied by the module: x (2, 3), Linear(3, 4).
    x = jax.random.normal(kx, (2, 3), dtype=jnp.float32)
    w = jax.random.normal(kw, (4, 3), dtype=jnp.float32) * 0.5
    b = jax.random.normal(kb, (4,), dtype=jnp.float32) * 0.1

    out = jax.block_until_ready(model_forward(x, w, b))
    ref = _reference(x, w, b)
    assert out.shape == (8, 2), out.shape
    assert jnp.allclose(out, ref, atol=1e-5, rtol=1e-5), "mismatch (toy / fallback path)"

    # Gridded Pallas path: 2 tiles, lane-dense (3, N) input, single (8, TN) store.
    x_big = jax.random.normal(kx2, (4096, 3), dtype=jnp.float32)
    out_big = jax.block_until_ready(model_forward(x_big, w, b))
    ref_big = _reference(x_big, w, b)
    assert out_big.shape == (8, 4096), out_big.shape
    assert jnp.allclose(out_big, ref_big, atol=1e-5, rtol=1e-5), "mismatch (gridded)"

    # Ragged final tile: masked writeback on the last block.
    x_rag = jax.random.normal(kx3, (5000, 3), dtype=jnp.float32)
    out_rag = jax.block_until_ready(model_forward(x_rag, w, b))
    ref_rag = _reference(x_rag, w, b)
    assert out_rag.shape == (8, 5000), out_rag.shape
    assert jnp.allclose(out_rag, ref_rag, atol=1e-5, rtol=1e-5), "mismatch (ragged tile)"

    print("KERNEL_OK")
</pallas_src>

<mosaic_0001>
module attributes {stable_mosaic.version = 11 : i64} {
  func.func @kernel(%arg0: i32, %arg1: memref<3x2048xf32, #tpu.memory_space<vmem>>, %arg2: memref<8x1xf32, #tpu.memory_space<vmem>>, %arg3: memref<8x1xf32, #tpu.memory_space<vmem>>, %arg4: memref<8x1xf32, #tpu.memory_space<vmem>>, %arg5: memref<8x1xf32, #tpu.memory_space<vmem>>, %arg6: memref<8x2048xf32, #tpu.memory_space<vmem>>) attributes {dimension_semantics = [#tpu.dimension_semantics<parallel>], iteration_bounds = array<i64: 2>, scalar_prefetch = 0 : i64, scratch_operands = 0 : i64, tpu.core_type = #tpu.core_type<tc>, window_params = [{transform_indices = @transform_0, window_bounds = array<i64: 3, 2048>}, {pipeline_mode = #tpu.pipeline_mode<synchronous>, transform_indices = @transform_1, window_bounds = array<i64: 8, 1>}, {pipeline_mode = #tpu.pipeline_mode<synchronous>, transform_indices = @transform_2, window_bounds = array<i64: 8, 1>}, {pipeline_mode = #tpu.pipeline_mode<synchronous>, transform_indices = @transform_3, window_bounds = array<i64: 8, 1>}, {pipeline_mode = #tpu.pipeline_mode<synchronous>, transform_indices = @transform_4, window_bounds = array<i64: 8, 1>}, {transform_indices = @transform_5, window_bounds = array<i64: 8, 2048>}]} {
    %c0 = arith.constant 0 : index
    %c0_0 = arith.constant 0 : index
    %0 = vector.load %arg5[%c0, %c0_0] : memref<8x1xf32, #tpu.memory_space<vmem>>, vector<8x1xf32>
    %c0_1 = arith.constant 0 : index
    %c0_2 = arith.constant 0 : index
    %1 = vector.load %arg2[%c0_1, %c0_2] : memref<8x1xf32, #tpu.memory_space<vmem>>, vector<8x1xf32>
    %c0_3 = arith.constant 0 : index
    %c0_4 = arith.constant 0 : index
    %2 = vector.load %arg1[%c0_3, %c0_4] : memref<3x2048xf32, #tpu.memory_space<vmem>>, vector<1x2048xf32>
    %3 = vector.broadcast %1 : vector<8x1xf32> to vector<8x2048xf32>
    %4 = vector.broadcast %2 : vector<1x2048xf32> to vector<8x2048xf32>
    %5 = arith.mulf %3, %4 : vector<8x2048xf32>
    %6 = vector.broadcast %0 : vector<8x1xf32> to vector<8x2048xf32>
    %7 = arith.addf %6, %5 : vector<8x2048xf32>
    %c0_5 = arith.constant 0 : index
    %c0_6 = arith.constant 0 : index
    %8 = vector.load %arg3[%c0_5, %c0_6] : memref<8x1xf32, #tpu.memory_space<vmem>>, vector<8x1xf32>
    %c1 = arith.constant 1 : index
    %c0_7 = arith.constant 0 : index
    %9 = vector.load %arg1[%c1, %c0_7] : memref<3x2048xf32, #tpu.memory_space<vmem>>, vector<1x2048xf32>
    %10 = vector.broadcast %8 : vector<8x1xf32> to vector<8x2048xf32>
    %11 = vector.broadcast %9 : vector<1x2048xf32> to vector<8x2048xf32>
    %12 = arith.mulf %10, %11 : vector<8x2048xf32>
    %13 = arith.addf %7, %12 : vector<8x2048xf32>
    %c0_8 = arith.constant 0 : index
    %c0_9 = arith.constant 0 : index
    %14 = vector.load %arg4[%c0_8, %c0_9] : memref<8x1xf32, #tpu.memory_space<vmem>>, vector<8x1xf32>
    %c2 = arith.constant 2 : index
    %c0_10 = arith.constant 0 : index
    %15 = vector.load %arg1[%c2, %c0_10] : memref<3x2048xf32, #tpu.memory_space<vmem>>, vector<1x2048xf32>
    %16 = vector.broadcast %14 : vector<8x1xf32> to vector<8x2048xf32>
    %17 = vector.broadcast %15 : vector<1x2048xf32> to vector<8x2048xf32>
    %18 = arith.mulf %16, %17 : vector<8x2048xf32>
    %19 = arith.addf %13, %18 : vector<8x2048xf32>
    %c0_11 = arith.constant 0 : index
    %c0_12 = arith.constant 0 : index
    %20 = vector.load %arg6[%c0_11, %c0_12] : memref<8x2048xf32, #tpu.memory_space<vmem>>, vector<8x2048xf32>
    tpu.vector_store %arg6[%c0_11, %c0_12], %19 {strides = array<i32>} : memref<8x2048xf32, #tpu.memory_space<vmem>>, vector<8x2048xf32>,
    return
  }
  func.func @transform_0(%arg0: i32) -> (i32, i32) {
    %c0_i32 = arith.constant 0 : i32
    %c0_i32_0 = arith.constant 0 : i32
    return %c0_i32, %arg0 : i32, i32
  }
  func.func @transform_1(%arg0: i32) -> (i32, i32) {
    %c0_i32 = arith.constant 0 : i32
    %c0_i32_0 = arith.constant 0 : i32
    %c0_i32_1 = arith.constant 0 : i32
    return %c0_i32, %c0_i32_0 : i32, i32
  }
  func.func @transform_2(%arg0: i32) -> (i32, i32) {
    %c0_i32 = arith.constant 0 : i32
    %c0_i32_0 = arith.constant 0 : i32
    %c0_i32_1 = arith.constant 0 : i32
    return %c0_i32, %c0_i32_0 : i32, i32
  }
  func.func @transform_3(%arg0: i32) -> (i32, i32) {
    %c0_i32 = arith.constant 0 : i32
    %c0_i32_0 = arith.constant 0 : i32
    %c0_i32_1 = arith.constant 0 : i32
    return %c0_i32, %c0_i32_0 : i32, i32
  }
  func.func @transform_4(%arg0: i32) -> (i32, i32) {
    %c0_i32 = arith.constant 0 : i32
    %c0_i32_0 = arith.constant 0 : i32
    %c0_i32_1 = arith.constant 0 : i32
    return %c0_i32, %c0_i32_0 : i32, i32
  }
  func.func @transform_5(%arg0: i32) -> (i32, i32) {
    %c0_i32 = arith.constant 0 : i32
    %c0_i32_0 = arith.constant 0 : i32
    return %c0_i32, %arg0 : i32, i32
  }
}

</mosaic_0001>

<bundles_post_ra>
// kernel: tpu_custom_call.1
= control target key start
LH: loop header
LB: loop body
LE: loop exit
PB: predicated region body
PF: predicated region fallthrough
CT: control target
= control target key end

     0   :  { %10 = vsyncpa [#allocation3], 0  ;;  %s1325_s0 = inlined_call_operand.hbm [shape: f32[3,4096], index: 0, kind: input, shape index: {}]   ;;  %s1326_s1 = inlined_call_operand.vmem [shape: f32[8,1], index: 1, kind: input, shape index: {}]   ;;  %s1327_s2 = inlined_call_operand.vmem [shape: f32[8,1], index: 2, kind: input, shape index: {}]   ;;  %s1328_s3 = inlined_call_operand.vmem [shape: f32[8,1], index: 3, kind: input, shape index: {}]   ;;  %s1329_s4 = inlined_call_operand.vmem [shape: f32[8,1], index: 4, kind: input, shape index: {}]   ;;  %s1330_s5 = inlined_call_operand.hbm [shape: f32[8,4096], index: 5, kind: output, shape index: {}]  }
   0x1   :  { %12 = vsyncpa [#allocation3 + $0x1], 0 }
   0x2   :  { %13 = vsyncpa [#allocation4], 0 }
   0x3   :  { %15 = vsyncpa [#allocation4 + $0x1], 0  ;;  %s922_s18 = smov 0   ;;  %s924_s19 = smov 0  }
   0x4   :  { %s926_s20 = smov 0   ;;  %s928_s21 = smov 0  }
   0x5 LB: > { %s943_s22 = sadd.s32 4294967295, %s887_s21   ;;  %s721_s23 = sadd.s32 4294967294, %s887_s21   ;;  %s887_s21 = sphi %s928_s21, %s1369_s21   ;;  %s883_s20 = sphi %s926_s20, %s1368_s20   ;;  %s879_s19 = sphi %s924_s19, %s1367_s19   ;;  %s875_s18 = sphi %s922_s18, %s1366_s18  }
   0x6   : > { %s947_s24 = sadd.s32 1, %s887_s21   ;;  %s28_s25 = sadd.s32 1, %s883_s20 }
   0x7   : > { %s25_s26 = ssub.s32 %s887_s21, %s947_s24  ;;  %p35_p0 = scmp.ne.s32.totalorder %s883_s20, %s879_s19 }
   0x8   : > { %p26_p1 = scmp.eq.s32.totalorder %s25_s26, 0  ;;  %p36_p2 = scmp.eq.s32.totalorder %s887_s21, 0 }
   0x9   : > { %p41_p3 = scmp.ne.s32.totalorder %s879_s19, %s875_s18  ;;  %p42_p4 = scmp.eq.s32.totalorder %s943_s22, 0 }
   0xa   : > { %s959_s27 = scalar_select %p26_p1, %s883_s20, %s28_s25  }
   0xb   : > { %p961_p5 = por %p36_p2, %p35_p0  ;;  %p965_p6 = por %p42_p4, %p41_p3 }
   0xc   : > { %p149_p7 = scmp.eq.s32.totalorder %s943_s22, 1  ;;  %p155_p8 = scmp.eq.s32.totalorder %s721_s23, 1 }
   0xd   : > { %p754_p10 = scmp.lt.s32.totalorder %s887_s21, 2  ;;  %s187_s7 = sand.u32 1, %s883_s20  }
   0xe   : > { %p972_p11 = por %p149_p7, %p35_p0  ;;  %p976_p12 = por %p155_p8, %p41_p3 }
   0xf   : > { %s740_s8 = sshll.u32 %s887_s21, 10  ;;  %s724_s9 = sshll.u32 %s187_s7, 6 }
  0x10   : > { %s1334_s30 = scalar_select %p972_p11, 1, 0 }
  0x11   : > { %s1335_s6 = scalar_select %p976_p12, 1, 0 }
  0x12   : > { %s985_s12 = scalar_lea.hbm %s1325_s0, %s740_s8  ;;  %s191_s13 = scalar_lea.vmem [#allocation2], %s724_s9 }
  0x13   : > { %s199_s14 = sshll.u32 %s191_s13, 4  ;;  %p989_p13 = pnand %p754_p10, %p961_p5  ;;  %s993_s14 = int_to_ptr.vmem [resolvable:$true] %s199_s14 }
  0x14   : > { %s188_s16 = scalar_lea.sflag [#allocation3], %s187_s7  ;;  %s791_s17 = scalar_lea.hbm %s985_s12, 1024 }
  0x15   : > { %p792_p2 = scmp.ne.s32.totalorder %s985_s12, %s791_s17  ;;  %p793_p3 = pneg %p989_p13 }
  0x16   : > { %s796_s26 = scalar_lea.hbm %s1325_s0, 2048  ;;  %p797_p5 = scmp.lt.u32.totalorder %s985_s12, %s1325_s0 }
  0x17   : > { %p794_p4 = pnand %p793_p3, %p792_p2  ;;  %p798_p8 = scmp.lt.u32.totalorder %s796_s26, %s791_s17 }
  0x18   : > { %p800_p9 = scmp.lt.u32.totalorder %s791_s17, %s985_s12 }
  0x19   : > { %p795_p7 = pneg %p794_p4  ;;  %p799_p10 = por %p798_p8, %p797_p5 }
  0x1b   : > { %p801_p0 = por %p800_p9, %p799_p10 }
  0x1d   : > { %p802_p1 = pnand %p801_p0, %p795_p7 }
  0x1f   : > { %805 = shalt.err (!%p802_p1)
}
  0x20   : > { %s806_s7 = scalar_lea.vmem %s993_s14, 1024  ;;  %s889_s9 = smov [#allocation2]  }
  0x21   : > { %p807_p2 = scmp.ne.s32.totalorder %s993_s14, %s806_s7  ;;  %s811_s10 = sshll.u32 %s889_s9, 4  ;;  %s812_s10 = int_to_ptr.vmem [resolvable:$false] %s811_s10 }
  0x22   : > { %s813_s11 = scalar_lea.vmem %s812_s10, 2048  ;;  %p814_p11 = scmp.lt.s32.totalorder %s993_s14, %s812_s10 }
  0x23   : > { %p809_p4 = pnand %p807_p2, %p793_p3  ;;  %p815_p5 = scmp.lt.s32.totalorder %s813_s11, %s806_s7 }
  0x25   : > { %p810_p12 = pneg %p809_p4  ;;  %p816_p8 = por %p815_p5, %p814_p11 }
  0x27   : > { %p817_p9 = pnand %p816_p8, %p810_p12 }
  0x29   : > { %820 = shalt.err (!%p817_p9)
}
  0x2a   : > { %749 = dma.hbm_to_vmem [thread:$0]  (!%p989_p13), %s985_s12, 1024, %s993_s14, %s188_s16  }
  0x2b   : > { %p1337_p0 = scmp.lt.s32.totalorder %s887_s21, 3  ;;  %p1338_p1 = scmp.ge.s32.totalorder %s887_s21, 1 }
  0x2d   : > { %p205_p3 = pnand %p1338_p1, %p1337_p0 }
  0x2f   : > { %208 = sbr.rel (%p205_p3) target bundleno = 235 (0xeb), region = 40 }
  0x36   : > { %s1027_s13 = sand.u32 1, %s879_s19  }
  0x37   : > { %s728_s17 = sshll.u32 %s1027_s13, 6  ;;  %s211_s23 = scalar_lea.sflag [#allocation3], %s1027_s13 }
  0x38   : > { %s1031_s25 = scalar_lea.vmem [#allocation2], %s728_s17 }
  0x39   : > { %866 = dma.done.wait (%p965_p6), %s211_s23, 1024  }
  0x3a   : > { %868 = vsyncadd (%p965_p6), %s211_s23, 4294966272  ;;  %v890_v0 = vmov 0   ;;  %v372_v1 = vld [vmem:[%s1327_s2] sm:$0xff]  ;;  %v255_v5 = vlaneseq  ;;  %s729_s7 = sshll.u32 %s1027_s13, 7  ;;  %s741_s9 = sshll.u32 %s943_s22, 11 }
  0x3b   : > { %790 = vset.pattern.permute.xlu1 %v890_v0  ;;  %789 = vset.pattern.permute.xlu0 %v890_v0  ;;  %v244_v2 = vld [vmem:[%s1326_s1] sm:$0xff]  ;;  %s1247_s10 = scalar_lea.vmem [#allocation5], %s729_s7  ;;  %s1273_s23 = scalar_lea.hbm %s1330_s5, %s741_s9 }
  0x3c   : > { %379 = vperm.xlu1 %790, %v372_v1   ;;  %250 = vperm.xlu0 %789, %v244_v2   ;;  %v496_v3 = vld [vmem:[%s1328_s3] sm:$0xff]  ;;  %v256_v6 = vshrl.u32 %v255_v5, 7  ;;  %s651_s11 = sshll.u32 %s1247_s10, 4  ;;  %p1363_p11 = scmp.ne.s32.totalorder %s1334_s30, 0  ;;  %s1275_s11 = int_to_ptr.vmem [resolvable:$true] %s651_s11 }
  0x3d   : > { %v243_v4 = vld [vmem:[%s1329_s4] sm:$0xff]  ;;  %s821_s12 = scalar_lea.vmem %s1275_s11, 2048  ;;  %s891_s14 = smov [#allocation5]  }
  0x3e   : > { %v1050_v7 = vld [vmem:[%s1031_s25 + $0x2] ss:$4 sm:$0xff]  ;;  %v1052_v8 = vsub.s32 0, %v256_v6  ;;  %v1054_v9 = vsub.s32 1, %v256_v6  ;;  %v1056_v10 = vsub.s32 2, %v256_v6  ;;  %v1058_v11 = vsub.s32 3, %v256_v6  ;;  %p822_p6 = scmp.ne.s32.totalorder %s1275_s11, %s821_s12 }
  0x3f   : > { %v1060_v12 = vsub.s32 4, %v256_v6  ;;  %v1062_v13 = vsub.s32 5, %v256_v6  ;;  %v1064_v14 = vsub.s32 6, %v256_v6  ;;  %v1066_v15 = vsub.s32 7, %v256_v6  ;;  %v1069_v16 = vld [vmem:[%s1031_s25 + $0x22] ss:$4 sm:$0xff] }
  0x40   : > { %503 = vperm.xlu1 %790, %v496_v3   ;;  %353 = vperm.xlu0 %789, %v243_v4   ;;  %v511_v17 = vrot.slane %v1050_v7, %v1052_v8  ;;  %v515_v18 = vrot.slane %v1050_v7, %v1054_v9  ;;  %v245_v25 = vld [vmem:[%s1031_s25] ss:$4 sm:$0xff]  ;;  %v1114_v43 = vld [vmem:[%s1031_s25 + $0x1] ss:$4 sm:$0xff]  ;;  %p823_p12 = pnand %p822_p6, %p1363_p11  ;;  %s825_s15 = sshll.u32 %s891_s14, 4  ;;  %s826_s15 = int_to_ptr.vmem [resolvable:$false] %s825_s15 }
  0x41   : > { %v730_v34 = vld [vmem:[%s1031_s25 + $0x20] ss:$4 sm:$0xff]  ;;  %v258_v35 = vrot.slane %v245_v25, %v1052_v8  ;;  %v262_v36 = vrot.slane %v245_v25, %v1054_v9  ;;  %v266_v37 = vrot.slane %v245_v25, %v1056_v10  ;;  %v270_v38 = vrot.slane %v245_v25, %v1058_v11  ;;  %v1125_v52 = vld [vmem:[%s1031_s25 + $0x21] ss:$4 sm:$0xff]  ;;  %s637_s25 = scalar_lea.sflag [#allocation4], %s1027_s13  ;;  %s827_s16 = scalar_lea.vmem %s826_s15, 4096 }
  0x42   : > { %v274_v39 = vrot.slane %v245_v25, %v1060_v12  ;;  %v278_v40 = vrot.slane %v245_v25, %v1062_v13  ;;  %v282_v41 = vrot.slane %v245_v25, %v1064_v14  ;;  %v286_v42 = vrot.slane %v245_v25, %v1066_v15  ;;  %p824_p13 = pneg %p823_p12  ;;  %p828_p7 = scmp.lt.s32.totalorder %s1275_s11, %s826_s15 }
  0x43   : > { %v290_v44 = vrot.slane %v730_v34, %v1052_v8  ;;  %v294_v45 = vrot.slane %v730_v34, %v1054_v9  ;;  %v298_v46 = vrot.slane %v730_v34, %v1056_v10  ;;  %v302_v47 = vrot.slane %v730_v34, %v1058_v11  ;;  %p829_p10 = scmp.lt.s32.totalorder %s827_s16, %s821_s12 }
  0x44   : > { %v306_v48 = vrot.slane %v730_v34, %v1060_v12  ;;  %v310_v49 = vrot.slane %v730_v34, %v1062_v13  ;;  %v314_v50 = vrot.slane %v730_v34, %v1064_v14  ;;  %v318_v51 = vrot.slane %v730_v34, %v1066_v15 }
  0x45   : > { %v387_v53 = vrot.slane %v1114_v43, %v1052_v8  ;;  %v391_v54 = vrot.slane %v1114_v43, %v1054_v9  ;;  %v395_v55 = vrot.slane %v1114_v43, %v1056_v10  ;;  %v399_v56 = vrot.slane %v1114_v43, %v1058_v11  ;;  %p830_p2 = por %p829_p10, %p828_p7 }
  0x46   : > { %v403_v57 = vrot.slane %v1114_v43, %v1060_v12  ;;  %v407_v58 = vrot.slane %v1114_v43, %v1062_v13  ;;  %v411_v59 = vrot.slane %v1114_v43, %v1064_v14  ;;  %v415_v60 = vrot.slane %v1114_v43, %v1066_v15 }
  0x47   : > { %v419_v61 = vrot.slane %v1125_v52, %v1052_v8  ;;  %v423_v62 = vrot.slane %v1125_v52, %v1054_v9  ;;  %v427_v63 = vrot.slane %v1125_v52, %v1056_v10  ;;  %v431_v0 = vrot.slane %v1125_v52, %v1058_v11  ;;  %p831_p4 = pnand %p830_p2, %p824_p13 }
  0x48   : > { %v435_v3 = vrot.slane %v1125_v52, %v1060_v12  ;;  %v439_v4 = vrot.slane %v1125_v52, %v1062_v13  ;;  %v443_v5 = vrot.slane %v1125_v52, %v1064_v14  ;;  %v447_v6 = vrot.slane %v1125_v52, %v1066_v15 }
  0x49   : > { %v1347_v52 = vrot.slane %v1069_v16, %v1056_v10 }
  0xbb   : > { %v380_v1 = vpop.permute.xlu1 %379  ;;  %v251_v2 = vpop.permute.xlu0 %250 }
  0xbc   : > { %v335_v25 = vmul.f32 %v258_v35, %v251_v2  ;;  %v336_v34 = vmul.f32 %v262_v36, %v251_v2  ;;  %v337_v43 = vmul.f32 %v266_v37, %v251_v2  ;;  %v338_v33 = vmul.f32 %v270_v38, %v251_v2 }
  0xbd   : > { %v339_v32 = vmul.f32 %v274_v39, %v251_v2  ;;  %v340_v31 = vmul.f32 %v278_v40, %v251_v2  ;;  %v341_v30 = vmul.f32 %v282_v41, %v251_v2  ;;  %v342_v29 = vmul.f32 %v286_v42, %v251_v2 }
  0xbe   : > { %v343_v28 = vmul.f32 %v290_v44, %v251_v2  ;;  %v344_v27 = vmul.f32 %v294_v45, %v251_v2  ;;  %v345_v26 = vmul.f32 %v298_v46, %v251_v2  ;;  %v346_v24 = vmul.f32 %v302_v47, %v251_v2 }
  0xbf   : > { %v504_v23 = vpop.permute.xlu1 %503  ;;  %v347_v22 = vmul.f32 %v306_v48, %v251_v2  ;;  %v348_v21 = vmul.f32 %v310_v49, %v251_v2  ;;  %v349_v20 = vmul.f32 %v314_v50, %v251_v2  ;;  %v350_v19 = vmul.f32 %v318_v51, %v251_v2 }
  0xc0   : > { %v1162_v35 = vmul.f32 %v511_v17, %v504_v23  ;;  %v1167_v36 = vmul.f32 %v515_v18, %v504_v23  ;;  %v1339_v37 = vrot.slane %v1050_v7, %v1056_v10  ;;  %v1340_v39 = vrot.slane %v1050_v7, %v1058_v11 }
  0xc1   : > { %v1341_v41 = vrot.slane %v1050_v7, %v1060_v12  ;;  %v1342_v42 = vrot.slane %v1050_v7, %v1062_v13  ;;  %v1343_v44 = vrot.slane %v1050_v7, %v1064_v14  ;;  %v1344_v46 = vrot.slane %v1050_v7, %v1066_v15 }
  0xc2   : > { %v1172_v38 = vmul.f32 %v1339_v37, %v504_v23  ;;  %v1177_v40 = vmul.f32 %v1340_v39, %v504_v23  ;;  %v1345_v48 = vrot.slane %v1069_v16, %v1052_v8  ;;  %v1346_v50 = vrot.slane %v1069_v16, %v1054_v9 }
  0xc3   : > { %v1182_v17 = vmul.f32 %v1341_v41, %v504_v23  ;;  %v1187_v18 = vmul.f32 %v1342_v42, %v504_v23  ;;  %v1192_v45 = vmul.f32 %v1343_v44, %v504_v23  ;;  %v1197_v47 = vmul.f32 %v1344_v46, %v504_v23 }
  0xc4   : > { %v1202_v49 = vmul.f32 %v1345_v48, %v504_v23  ;;  %v1207_v51 = vmul.f32 %v1346_v50, %v504_v23  ;;  %v1212_v2 = vmul.f32 %v1347_v52, %v504_v23  ;;  %v1349_v7 = vrot.slane %v1069_v16, %v1058_v11 }
  0xc5   : > { %v1351_v8 = vrot.slane %v1069_v16, %v1060_v12  ;;  %v1353_v9 = vrot.slane %v1069_v16, %v1062_v13  ;;  %v1355_v10 = vrot.slane %v1069_v16, %v1064_v14  ;;  %v1357_v11 = vrot.slane %v1069_v16, %v1066_v15 }
  0xc6   : > { %1348 = vst [vmem:[#allocation8_spill] sm:$0xff] %v1212_v2  ;;  %v1217_v37 = vmul.f32 %v1349_v7, %v504_v23  ;;  %v464_v46 = vmul.f32 %v387_v53, %v380_v1  ;;  %v465_v48 = vmul.f32 %v391_v54, %v380_v1  ;;  %v466_v12 = vmul.f32 %v395_v55, %v380_v1 }
  0xc7   : > { %v1222_v39 = vmul.f32 %v1351_v8, %v504_v23  ;;  %v1227_v41 = vmul.f32 %v1353_v9, %v504_v23  ;;  %v1232_v42 = vmul.f32 %v1355_v10, %v504_v23  ;;  %v1237_v44 = vmul.f32 %v1357_v11, %v504_v23  ;;  %v354_v9 = vpop.permute.xlu0 %353 }
  0xc8   : > { %1350 = vst [vmem:[#allocation9_spill] sm:$0xff] %v1217_v37  ;;  %v467_v50 = vmul.f32 %v399_v56, %v380_v1  ;;  %v468_v52 = vmul.f32 %v403_v57, %v380_v1  ;;  %v469_v7 = vmul.f32 %v407_v58, %v380_v1  ;;  %v470_v8 = vmul.f32 %v411_v59, %v380_v1 }
  0xc9   : > { %1352 = vst [vmem:[#allocation10_spill] sm:$0xff] %v1222_v39  ;;  %1354 = vst [vmem:[#allocation11_spill] sm:$0xff] %v1227_v41  ;;  %v471_v13 = vmul.f32 %v415_v60, %v380_v1  ;;  %v472_v41 = vmul.f32 %v419_v61, %v380_v1  ;;  %v473_v39 = vmul.f32 %v423_v62, %v380_v1 }
  0xca   : > { %1356 = vst [vmem:[#allocation12_spill] sm:$0xff] %v1232_v42  ;;  %v474_v14 = vmul.f32 %v427_v63, %v380_v1  ;;  %v475_v10 = vmul.f32 %v431_v0, %v380_v1  ;;  %v476_v42 = vmul.f32 %v435_v3, %v380_v1  ;;  %v477_v37 = vmul.f32 %v439_v4, %v380_v1 }
  0xcb   : > { %v478_v2 = vmul.f32 %v443_v5, %v380_v1  ;;  %v479_v15 = vmul.f32 %v447_v6, %v380_v1  ;;  %v356_v16 = vadd.f32 %v354_v9, %v335_v25  ;;  %v357_v23 = vadd.f32 %v354_v9, %v336_v34 }
  0xcc   : > { %v358_v53 = vadd.f32 %v354_v9, %v337_v43  ;;  %v359_v54 = vadd.f32 %v354_v9, %v338_v33  ;;  %v360_v55 = vadd.f32 %v354_v9, %v339_v32  ;;  %v361_v56 = vadd.f32 %v354_v9, %v340_v31 }
  0xcd   : > { %v362_v57 = vadd.f32 %v354_v9, %v341_v30  ;;  %v363_v58 = vadd.f32 %v354_v9, %v342_v29  ;;  %v364_v59 = vadd.f32 %v354_v9, %v343_v28  ;;  %v365_v60 = vadd.f32 %v354_v9, %v344_v27 }
  0xce   : > { %v366_v61 = vadd.f32 %v354_v9, %v345_v26  ;;  %v367_v11 = vadd.f32 %v354_v9, %v346_v24  ;;  %v368_v62 = vadd.f32 %v354_v9, %v347_v22  ;;  %v369_v63 = vadd.f32 %v354_v9, %v348_v21 }
  0xcf   : > { %v370_v0 = vadd.f32 %v354_v9, %v349_v20  ;;  %v371_v3 = vadd.f32 %v354_v9, %v350_v19  ;;  %v480_v4 = vadd.f32 %v464_v46, %v356_v16  ;;  %v481_v5 = vadd.f32 %v465_v48, %v357_v23 }
  0xd0   : > { %v482_v1 = vadd.f32 %v466_v12, %v358_v53  ;;  %v483_v6 = vadd.f32 %v467_v50, %v359_v54  ;;  %v484_v25 = vadd.f32 %v468_v52, %v360_v55  ;;  %v485_v33 = vadd.f32 %v469_v7, %v361_v56 }
  0xd1   : > { %v486_v31 = vadd.f32 %v470_v8, %v362_v57  ;;  %v487_v30 = vadd.f32 %v471_v13, %v363_v58  ;;  %v488_v29 = vadd.f32 %v472_v41, %v364_v59  ;;  %v489_v32 = vadd.f32 %v473_v39, %v365_v60  ;;  %v1358_v39 = vld [vmem:[#allocation8_spill] sm:$0xff] }
  0xd2   : > { %v490_v28 = vadd.f32 %v474_v14, %v366_v61  ;;  %v491_v27 = vadd.f32 %v475_v10, %v367_v11  ;;  %v492_v26 = vadd.f32 %v476_v42, %v368_v62  ;;  %v493_v24 = vadd.f32 %v477_v37, %v369_v63  ;;  %v1359_v42 = vld [vmem:[#allocation9_spill] sm:$0xff] }
  0xd3   : > { %v494_v22 = vadd.f32 %v478_v2, %v370_v0  ;;  %v495_v21 = vadd.f32 %v479_v15, %v371_v3  ;;  %v604_v19 = vadd.f32 %v1162_v35, %v480_v4  ;;  %v605_v20 = vadd.f32 %v1167_v36, %v481_v5 }
  0xd4   : > { %v606_v34 = vadd.f32 %v1172_v38, %v482_v1  ;;  %v607_v43 = vadd.f32 %v1177_v40, %v483_v6  ;;  %v608_v2 = vadd.f32 %v1182_v17, %v484_v25  ;;  %v609_v35 = vadd.f32 %v1187_v18, %v485_v33  ;;  %v1360_v17 = vld [vmem:[#allocation10_spill] sm:$0xff] }
  0xd5   : > { %v610_v36 = vadd.f32 %v1192_v45, %v486_v31  ;;  %v611_v38 = vadd.f32 %v1197_v47, %v487_v30  ;;  %v612_v40 = vadd.f32 %v1202_v49, %v488_v29  ;;  %v613_v37 = vadd.f32 %v1207_v51, %v489_v32  ;;  %620 = vst [vmem:[%s1247_s10] sm:$0xff] %v604_v19  ;;  %v1361_v45 = vld [vmem:[#allocation11_spill] sm:$0xff]  ;;  %v1362_v49 = vld [vmem:[#allocation12_spill] sm:$0xff] }
  0xd6   : > { %v614_v41 = vadd.f32 %v1358_v39, %v490_v28  ;;  %v615_v46 = vadd.f32 %v1359_v42, %v491_v27  ;;  %621 = vst [vmem:[%s1247_s10 + $0x8] sm:$0xff] %v605_v20  ;;  %622 = vst [vmem:[%s1247_s10 + $0x10] sm:$0xff] %v606_v34  ;;  %v616_v18 = vadd.f32 %v1360_v17, %v492_v26 }
  0xd7   : > { %623 = vst [vmem:[%s1247_s10 + $0x18] sm:$0xff] %v607_v43  ;;  %v617_v47 = vadd.f32 %v1361_v45, %v493_v24  ;;  %v618_v51 = vadd.f32 %v1362_v49, %v494_v22  ;;  %v619_v48 = vadd.f32 %v1237_v44, %v495_v21  ;;  %624 = vst [vmem:[%s1247_s10 + $0x20] sm:$0xff] %v608_v2 }
  0xd8   : > { %625 = vst [vmem:[%s1247_s10 + $0x28] sm:$0xff] %v609_v35  ;;  %626 = vst [vmem:[%s1247_s10 + $0x30] sm:$0xff] %v610_v36 }
  0xd9   : > { %627 = vst [vmem:[%s1247_s10 + $0x38] sm:$0xff] %v611_v38  ;;  %628 = vst [vmem:[%s1247_s10 + $0x40] sm:$0xff] %v612_v40 }
  0xda   : > { %629 = vst [vmem:[%s1247_s10 + $0x48] sm:$0xff] %v613_v37  ;;  %630 = vst [vmem:[%s1247_s10 + $0x50] sm:$0xff] %v614_v41 }
  0xdb   : > { %631 = vst [vmem:[%s1247_s10 + $0x58] sm:$0xff] %v615_v46  ;;  %632 = vst [vmem:[%s1247_s10 + $0x60] sm:$0xff] %v616_v18 }
  0xdc   : > { %633 = vst [vmem:[%s1247_s10 + $0x68] sm:$0xff] %v617_v47  ;;  %634 = vst [vmem:[%s1247_s10 + $0x70] sm:$0xff] %v618_v51 }
  0xdd   : > { %635 = vst [vmem:[%s1247_s10 + $0x78] sm:$0xff] %v619_v48 }
  0xde   : > { %834 = shalt.err (!%p831_p4)
}
  0xdf   : > { %s835_s13 = scalar_lea.hbm %s1273_s23, 2048  ;;  %s839_s29 = scalar_lea.hbm %s1330_s5, 4096 }
  0xe0   : > { %p836_p5 = scmp.ne.s32.totalorder %s1273_s23, %s835_s13  ;;  %p840_p0 = scmp.lt.u32.totalorder %s1273_s23, %s1330_s5 }
  0xe1   : > { %p841_p1 = scmp.lt.u32.totalorder %s839_s29, %s835_s13  ;;  %p843_p6 = scmp.lt.u32.totalorder %s835_s13, %s1273_s23 }
  0xe2   : > { %p837_p8 = pnand %p836_p5, %p1363_p11 }
  0xe3   : > { %p842_p3 = por %p841_p1, %p840_p0 }
  0xe4   : > { %p838_p9 = pneg %p837_p8 }
  0xe5   : > { %p844_p12 = por %p843_p6, %p842_p3 }
  0xe7   : > { %p845_p13 = pnand %p844_p12, %p838_p9 }
  0xe9   : > { %848 = shalt.err (!%p845_p13)
}
  0xea   : > { %744 = dma.vmem_to_hbm [thread:$0]  (%p1363_p11), %s1275_s11, 2048, %s1273_s23, %s637_s25  }
  0xeb PF: > { %s663_s9 = sand.u32 1, %s875_s18   ;;  %p1364_p7 = scmp.ne.s32.totalorder %s1335_s6, 0 }
  0xec   : > { %p1365_p10 = scmp.ge.s32.totalorder %s887_s21, 2  ;;  %s664_s10 = scalar_lea.sflag [#allocation4], %s663_s9 }
  0xee   : > { %p751_p2 = pnand %p1365_p10, %p1364_p7 }
  0xf0   : > { %870 = dma.done.wait (!%p751_p2), %s664_s10, 2048  }
  0xf1   : > { %872 = vsyncadd (!%p751_p2), %s664_s10, 4294965248  ;;  %p18_p4 = scmp.ge.s32.totalorder %s947_s24, 4   ;;  %s1366_s18 = smov %s879_s19 }
  0xf2   : > { %s1367_s19 = smov %s883_s20  ;;  %s1368_s20 = smov %s959_s27 }
  0xf3   : > { %s1369_s21 = smov %s947_s24  ;;  %20 = sbr.rel (!%p18_p4) target bundleno = 5 (0x5), region = 90 }
  0xfa   :  { %669 = vsyncpa [#allocation3], 1 }
  0xfb   :  { %671 = vsyncpa [#allocation3 + $0x1], 1 }
  0xfc   :  { %672 = vsyncpa [#allocation4], 1 }
  0xfd   :  { %674 = vsyncpa [#allocation4 + $0x1], 1 }

</bundles_post_ra>
